<compile_context>
chip_gen: v6e
topology: v6e:2x2x1
jax: 0.10.0
libtpu: 0.0.40
codegen_flags: <defaults>
</compile_context>

<pallas_src>
import functools

import jax
import jax.numpy as jnp
from jax import lax
from jax.experimental import pallas as pl
from jax.experimental.pallas import tpu as pltpu

# dot_general dim numbers: contract dim 0 of both operands ("T @ N" matmul).
TN_DIM_NUMBERS = (((0,), (0,)), ((), ()))


def _vmem_limit_bytes():
    """Generation-dependent scoped-VMEM cap: ~3/4 of physical, capped at 112 MiB."""
    cap = 64 * 1024 * 1024
    try:
        info = pltpu.get_tpu_info()
        cap = int(getattr(info, "vmem_capacity_bytes", cap))
    except Exception:
        pass
    return int(min(cap * 3 // 4, 112 * 1024 * 1024))


# --------------------------------------------------------------------------------------
# Prologue: k / v 1x1-conv projections, computed once per batch, stored as bf16 in HBM.
# --------------------------------------------------------------------------------------
def kv_proj_kernel(x_ref, wk_ref, bk_ref, wv_ref, bv_ref, k_ref, v_ref):
    x_bf = x_ref[0].astype(jnp.bfloat16)                                  # (C, tp)
    k = jnp.dot(wk_ref[...], x_bf,
                preferred_element_type=jnp.float32) + bk_ref[...]         # (C8, tp) f32
    v = jnp.dot(wv_ref[...], x_bf,
                preferred_element_type=jnp.float32) + bv_ref[...]         # (C,  tp) f32
    k_ref[0] = k.astype(jnp.bfloat16)
    v_ref[0] = v.astype(jnp.bfloat16)


# --------------------------------------------------------------------------------------
# Flash attention kernel over precomputed bf16 k / v streams.
# --------------------------------------------------------------------------------------
def sa_flash_kernel(xq_ref, k_ref, v_ref, wq_ref, bq_ref, gamma_ref, o_ref,
                    q_sc, m_sc, l_sc, acc_sc):
    ki = pl.program_id(2)
    nk = pl.num_programs(2)

    @pl.when(ki == 0)
    def _():
        m_sc[...] = jnp.full_like(m_sc, -jnp.inf)
        l_sc[...] = jnp.zeros_like(l_sc)
        acc_sc[...] = jnp.zeros_like(acc_sc)
        # q projection is invariant in ki: compute once per query tile, keep in VMEM.
        x_q_bf = xq_ref[0].astype(jnp.bfloat16)                           # (C, tq)
        q = jnp.dot(wq_ref[...], x_q_bf,
                    preferred_element_type=jnp.float32) + bq_ref[...]     # (C8, tq)
        q_sc[...] = q.astype(jnp.bfloat16)

    k = k_ref[0]                                                          # (C8, tk) bf16
    v = v_ref[0]                                                          # (C,  tk) bf16

    # energy^T tile: e_t[j, i] = sum_c8 k[c8, j] * q[c8, i]               -> (tk, tq)
    e_t = lax.dot_general(k, q_sc[...],
                          dimension_numbers=TN_DIM_NUMBERS,
                          preferred_element_type=jnp.float32)

    # Online softmax over j (sublane axis of e_t); normalization deferred to the end.
    m_prev = m_sc[...]                                                    # (1, tq)
    m_new = jnp.maximum(m_prev, jnp.max(e_t, axis=0, keepdims=True))      # (1, tq)
    alpha = jnp.exp(m_prev - m_new)                                       # (1, tq)
    p_t = jnp.exp(e_t - m_new)                                            # (tk, tq)
    l_sc[...] = alpha * l_sc[...] + jnp.sum(p_t, axis=0, keepdims=True)
    acc_sc[...] = alpha * acc_sc[...] + jnp.dot(
        v, p_t.astype(jnp.bfloat16),
        preferred_element_type=jnp.float32)                               # (C, tq)
    m_sc[...] = m_new

    @pl.when(ki == nk - 1)
    def _():
        out = acc_sc[...] * pl.reciprocal(l_sc[...], approx=True)         # (C, tq)
        # Residual add with the original f32 x tile (exact).
        o_ref[0] = (gamma_ref[0] * out + xq_ref[0]).astype(o_ref.dtype)


@functools.partial(jax.jit, static_argnames=("tq", "tk"))
def sa_forward(x_nchw, wq, bq, wk, bk, wv, bv, gamma, *, tq=512, tk=512):
    """x_nchw: (B, C, H, W) float32.  Weights are (C_out, C_in) channel matrices.
    Returns (B, C, H, W)."""
    B, C, H, W = x_nchw.shape
    N = H * W
    C8 = wq.shape[0]
    tq = min(tq, N)
    tk = min(tk, N)
    assert C % 8 == 0, "in_dim must be a multiple of 8"
    assert N % tq == 0 and N % tk == 0, "H*W must be divisible by the tile sizes"
    assert (tq % 128 == 0) or (tq == N), "tq must be a multiple of 128 (or == H*W)"
    assert (tk % 128 == 0) or (tk == N), "tk must be a multiple of 128 (or == H*W)"

    # Flattened NCHW *is* (B, C, N): no transpose, only a free reshape.
    x_bcn = x_nchw.reshape(B, C, N)

    wq_bf = wq.astype(jnp.bfloat16)
    wk_bf = wk.astype(jnp.bfloat16)
    wv_bf = wv.astype(jnp.bfloat16)
    bq2 = bq.reshape(C8, 1).astype(jnp.float32)
    bk2 = bk.reshape(C8, 1).astype(jnp.float32)
    bv2 = bv.reshape(C, 1).astype(jnp.float32)
    gamma1 = gamma.reshape(1).astype(jnp.float32)

    vmem_limit = _vmem_limit_bytes()
    full = lambda *_: (0, 0)

    # ---- Prologue: project k and v once per batch, stored as bf16 in HBM. ----
    tp = tq  # reuse the (validated) query tile size for the projection pass
    k_bf, v_bf = pl.pallas_call(
        kv_proj_kernel,
        out_shape=(jax.ShapeDtypeStruct((B, C8, N), jnp.bfloat16),
                   jax.ShapeDtypeStruct((B, C, N), jnp.bfloat16)),
        grid_spec=pltpu.PrefetchScalarGridSpec(
            num_scalar_prefetch=0,
            grid=(B, N // tp),
            in_specs=[
                pl.BlockSpec((1, C, tp), lambda b, ni: (b, 0, ni)),  # x tile (f32)
                pl.BlockSpec((C8, C), full),                         # Wk (bf16)
                pl.BlockSpec((C8, 1), full),                         # bk
                pl.BlockSpec((C, C), full),                          # Wv (bf16)
                pl.BlockSpec((C, 1), full),                          # bv
            ],
            out_specs=[pl.BlockSpec((1, C8, tp), lambda b, ni: (b, 0, ni)),
                       pl.BlockSpec((1, C, tp), lambda b, ni: (b, 0, ni))],
        ),
        compiler_params=pltpu.CompilerParams(
            dimension_semantics=("parallel", "parallel"),
            vmem_limit_bytes=vmem_limit,
        ),
    )(x_bcn, wk_bf, bk2, wv_bf, bv2)

    # ---- Flash attention over the precomputed bf16 k / v streams. ----
    grid = (B, N // tq, N // tk)
    out_bcn = pl.pallas_call(
        sa_flash_kernel,
        out_shape=jax.ShapeDtypeStruct((B, C, N), x_nchw.dtype),
        grid_spec=pltpu.PrefetchScalarGridSpec(
            num_scalar_prefetch=0,
            grid=grid,
            in_specs=[
                pl.BlockSpec((1, C, tq), lambda b, qi, ki: (b, 0, qi)),   # x, query tile
                pl.BlockSpec((1, C8, tk), lambda b, qi, ki: (b, 0, ki)),  # k tile (bf16)
                pl.BlockSpec((1, C, tk), lambda b, qi, ki: (b, 0, ki)),   # v tile (bf16)
                pl.BlockSpec((C8, C), full),                              # Wq (bf16)
                pl.BlockSpec((C8, 1), full),                              # bq
                pl.BlockSpec(memory_space=pltpu.MemorySpace.SMEM),        # gamma scalar
            ],
            out_specs=pl.BlockSpec((1, C, tq), lambda b, qi, ki: (b, 0, qi)),
            scratch_shapes=[
                pltpu.VMEM((C8, tq), jnp.bfloat16),  # hoisted q projection
                pltpu.VMEM((1, tq), jnp.float32),    # running max m
                pltpu.VMEM((1, tq), jnp.float32),    # running denom l
                pltpu.VMEM((C, tq), jnp.float32),    # unnormalized output accumulator
            ],
        ),
        compiler_params=pltpu.CompilerParams(
            dimension_semantics=("parallel", "parallel", "arbitrary"),
            vmem_limit_bytes=vmem_limit,
        ),
    )(x_bcn, k_bf, v_bf, wq_bf, bq2, gamma1)

    return out_bcn.reshape(B, C, H, W)


def sa_reference(x_nchw, wq, bq, wk, bk, wv, bv, gamma):
    """Pure-JAX (f32) reference mirroring the PyTorch forward pass."""
    B, C, H, W = x_nchw.shape
    N = H * W
    x = x_nchw.reshape(B, C, N)                                        # (B, C, N)
    q = jnp.einsum("oc,bcn->bon", wq, x) + bq[None, :, None]           # (B, C8, N)
    k = jnp.einsum("oc,bcn->bon", wk, x) + bk[None, :, None]           # (B, C8, N)
    v = jnp.einsum("oc,bcn->bon", wv, x) + bv[None, :, None]           # (B, C,  N)
    energy = jnp.einsum("bci,bcj->bij", q, k)                          # (B, N, N)
    att = jax.nn.softmax(energy, axis=-1)
    out = jnp.einsum("bcj,bij->bci", v, att)                           # (B, C, N)
    out = gamma[0] * out + x
    return out.reshape(B, C, H, W)


if __name__ == "__main__":
    # Small shapes consistent with the module (in_dim must be a multiple of 8).
    B, C, H, W = 2, 32, 16, 16
    C8 = C // 8
    N = H * W

    key = jax.random.PRNGKey(0)
    kx, kq, kk, kv, kbq, kbk, kbv = jax.random.split(key, 7)

    x = jax.random.normal(kx, (B, C, H, W), dtype=jnp.float32)

    # 1x1 conv weights stored as (C_out, C_in) channel matrices (conv kernel squeezed).
    wq = 0.1 * jax.random.normal(kq, (C8, C), dtype=jnp.float32)
    wk = 0.1 * jax.random.normal(kk, (C8, C), dtype=jnp.float32)
    wv = 0.1 * jax.random.normal(kv, (C, C), dtype=jnp.float32)
    bq = 0.01 * jax.random.normal(kbq, (C8,), dtype=jnp.float32)
    bk = 0.01 * jax.random.normal(kbk, (C8,), dtype=jnp.float32)
    bv = 0.01 * jax.random.normal(kbv, (C,), dtype=jnp.float32)
    # The module inits gamma to 0 (out == x); use a nonzero value so the attention
    # path is actually exercised.
    gamma = jnp.full((1,), 0.5, dtype=jnp.float32)

    # tq=tk=128 with N=256 exercises multiple query tiles, the hoisted-q path AND the
    # online-softmax accumulation across kv tiles.
    out = sa_forward(x, wq, bq, wk, bk, wv, bv, gamma, tq=128, tk=128)
    out = jax.block_until_ready(out)

    ref = sa_reference(x, wq, bq, wk, bk, wv, bv, gamma)
    assert out.shape == (B, C, H, W)
    max_err = jnp.max(jnp.abs(out - ref))
    # bf16 MXU inputs + EUP approx reciprocal -> looser tolerance than pure f32.
    assert jnp.allclose(out, ref, atol=3e-2, rtol=3e-2), (
        f"mismatch vs reference (max abs err {max_err})")

    print("KERNEL_OK")
</pallas_src>

<mosaic_0001>
module attributes {stable_mosaic.version = 11 : i64} {
  func.func @kv_proj_kernel(%arg0: i32, %arg1: i32, %arg2: memref<1x32x128xf32, #tpu.memory_space<vmem>>, %arg3: memref<4x32xbf16, #tpu.memory_space<vmem>>, %arg4: memref<4x1xf32, #tpu.memory_space<vmem>>, %arg5: memref<32x32xbf16, #tpu.memory_space<vmem>>, %arg6: memref<32x1xf32, #tpu.memory_space<vmem>>, %arg7: memref<1x4x128xbf16, #tpu.memory_space<vmem>>, %arg8: memref<1x32x128xbf16, #tpu.memory_space<vmem>>) attributes {dimension_semantics = [#tpu.dimension_semantics<parallel>, #tpu.dimension_semantics<parallel>], iteration_bounds = array<i64: 2, 2>, scalar_prefetch = 0 : i64, scratch_operands = 0 : i64, tpu.core_type = #tpu.core_type<tc>, window_params = [{transform_indices = @transform_0, window_bounds = array<i64: 1, 32, 128>}, {pipeline_mode = #tpu.pipeline_mode<synchronous>, transform_indices = @transform_1, window_bounds = array<i64: 4, 32>}, {pipeline_mode = #tpu.pipeline_mode<synchronous>, transform_indices = @transform_2, window_bounds = array<i64: 4, 1>}, {pipeline_mode = #tpu.pipeline_mode<synchronous>, transform_indices = @transform_3, window_bounds = array<i64: 32, 32>}, {pipeline_mode = #tpu.pipeline_mode<synchronous>, transform_indices = @transform_4, window_bounds = array<i64: 32, 1>}, {transform_indices = @transform_5, window_bounds = array<i64: 1, 4, 128>}, {transform_indices = @transform_6, window_bounds = array<i64: 1, 32, 128>}]} {
    %c0 = arith.constant 0 : index
    %c0_0 = arith.constant 0 : index
    %c0_1 = arith.constant 0 : index
    %0 = vector.load %arg2[%c0, %c0_0, %c0_1] : memref<1x32x128xf32, #tpu.memory_space<vmem>>, vector<1x32x128xf32>
    %1 = vector.shape_cast %0 : vector<1x32x128xf32> to vector<32x128xf32>
    %2 = arith.truncf %1 : vector<32x128xf32> to vector<32x128xbf16>
    %c0_2 = arith.constant 0 : index
    %c0_3 = arith.constant 0 : index
    %3 = vector.load %arg3[%c0_2, %c0_3] : memref<4x32xbf16, #tpu.memory_space<vmem>>, vector<4x32xbf16>
    %cst = arith.constant dense<0.000000e+00> : vector<4x128xf32>
    %4 = tpu.matmul %3, %2, %cst {dimension_numbers = #tpu.dot_dimension_numbers<[1], [0], [0], [1], [0, 0, 1, 1], [], []>} : vector<4x32xbf16>, vector<32x128xbf16>, vector<4x128xf32> -> vector<4x128xf32>
    %c0_4 = arith.constant 0 : index
    %c0_5 = arith.constant 0 : index
    %5 = vector.load %arg4[%c0_4, %c0_5] : memref<4x1xf32, #tpu.memory_space<vmem>>, vector<4x1xf32>
    %6 = vector.broadcast %5 : vector<4x1xf32> to vector<4x128xf32>
    %7 = arith.addf %4, %6 : vector<4x128xf32>
    %c0_6 = arith.constant 0 : index
    %c0_7 = arith.constant 0 : index
    %8 = vector.load %arg5[%c0_6, %c0_7] : memref<32x32xbf16, #tpu.memory_space<vmem>>, vector<32x32xbf16>
    %cst_8 = arith.constant dense<0.000000e+00> : vector<32x128xf32>
    %9 = tpu.matmul %8, %2, %cst_8 {dimension_numbers = #tpu.dot_dimension_numbers<[1], [0], [0], [1], [0, 0, 1, 1], [], []>} : vector<32x32xbf16>, vector<32x128xbf16>, vector<32x128xf32> -> vector<32x128xf32>
    %c0_9 = arith.constant 0 : index
    %c0_10 = arith.constant 0 : index
    %10 = vector.load %arg6[%c0_9, %c0_10] : memref<32x1xf32, #tpu.memory_space<vmem>>, vector<32x1xf32>
    %11 = vector.broadcast %10 : vector<32x1xf32> to vector<32x128xf32>
    %12 = arith.addf %9, %11 : vector<32x128xf32>
    %13 = arith.truncf %7 : vector<4x128xf32> to vector<4x128xbf16>
    %c0_11 = arith.constant 0 : index
    %c0_12 = arith.constant 0 : index
    %c0_13 = arith.constant 0 : index
    %14 = vector.load %arg7[%c0_11, %c0_12, %c0_13] : memref<1x4x128xbf16, #tpu.memory_space<vmem>>, vector<1x4x128xbf16>
    %15 = vector.shape_cast %14 : vector<1x4x128xbf16> to vector<4x128xbf16>
    %16 = vector.shape_cast %13 : vector<4x128xbf16> to vector<1x4x128xbf16>
    tpu.vector_store %arg7[%c0_11, %c0_12, %c0_13], %16 {strides = array<i32>} : memref<1x4x128xbf16, #tpu.memory_space<vmem>>, vector<1x4x128xbf16>,
    %17 = arith.truncf %12 : vector<32x128xf32> to vector<32x128xbf16>
    %c0_14 = arith.constant 0 : index
    %c0_15 = arith.constant 0 : index
    %c0_16 = arith.constant 0 : index
    %18 = vector.load %arg8[%c0_14, %c0_15, %c0_16] : memref<1x32x128xbf16, #tpu.memory_space<vmem>>, vector<1x32x128xbf16>
    %19 = vector.shape_cast %18 : vector<1x32x128xbf16> to vector<32x128xbf16>
    %20 = vector.shape_cast %17 : vector<32x128xbf16> to vector<1x32x128xbf16>
    tpu.vector_store %arg8[%c0_14, %c0_15, %c0_16], %20 {strides = array<i32>} : memref<1x32x128xbf16, #tpu.memory_space<vmem>>, vector<1x32x128xbf16>,
    return
  }
  func.func @transform_0(%arg0: i32, %arg1: i32) -> (i32, i32, i32) {
    %c0_i32 = arith.constant 0 : i32
    %c0_i32_0 = arith.constant 0 : i32
    return %arg0, %c0_i32, %arg1 : i32, i32, i32
  }
  func.func @transform_1(%arg0: i32, %arg1: i32) -> (i32, i32) {
    %c0_i32 = arith.constant 0 : i32
    %c0_i32_0 = arith.constant 0 : i32
    %c0_i32_1 = arith.constant 0 : i32
    return %c0_i32, %c0_i32_0 : i32, i32
  }
  func.func @transform_2(%arg0: i32, %arg1: i32) -> (i32, i32) {
    %c0_i32 = arith.constant 0 : i32
    %c0_i32_0 = arith.constant 0 : i32
    %c0_i32_1 = arith.constant 0 : i32
    return %c0_i32, %c0_i32_0 : i32, i32
  }
  func.func @transform_3(%arg0: i32, %arg1: i32) -> (i32, i32) {
    %c0_i32 = arith.constant 0 : i32
    %c0_i32_0 = arith.constant 0 : i32
    %c0_i32_1 = arith.constant 0 : i32
    return %c0_i32, %c0_i32_0 : i32, i32
  }
  func.func @transform_4(%arg0: i32, %arg1: i32) -> (i32, i32) {
    %c0_i32 = arith.constant 0 : i32
    %c0_i32_0 = arith.constant 0 : i32
    %c0_i32_1 = arith.constant 0 : i32
    return %c0_i32, %c0_i32_0 : i32, i32
  }
  func.func @transform_5(%arg0: i32, %arg1: i32) -> (i32, i32, i32) {
    %c0_i32 = arith.constant 0 : i32
    %c0_i32_0 = arith.constant 0 : i32
    return %arg0, %c0_i32, %arg1 : i32, i32, i32
  }
  func.func @transform_6(%arg0: i32, %arg1: i32) -> (i32, i32, i32) {
    %c0_i32 = arith.constant 0 : i32
    %c0_i32_0 = arith.constant 0 : i32
    return %arg0, %c0_i32, %arg1 : i32, i32, i32
  }
}

module attributes {stable_mosaic.version = 11 : i64} {
  func.func @sa_flash_kernel(%arg0: i32, %arg1: i32, %arg2: i32, %arg3: memref<1x32x128xf32, #tpu.memory_space<vmem>>, %arg4: memref<1x4x128xbf16, #tpu.memory_space<vmem>>, %arg5: memref<1x32x128xbf16, #tpu.memory_space<vmem>>, %arg6: memref<4x32xbf16, #tpu.memory_space<vmem>>, %arg7: memref<4x1xf32, #tpu.memory_space<vmem>>, %arg8: memref<1xf32, #tpu.memory_space<smem>>, %arg9: memref<1x32x128xf32, #tpu.memory_space<vmem>>, %arg10: memref<4x128xbf16, #tpu.memory_space<vmem>>, %arg11: memref<1x128xf32, #tpu.memory_space<vmem>>, %arg12: memref<1x128xf32, #tpu.memory_space<vmem>>, %arg13: memref<32x128xf32, #tpu.memory_space<vmem>>) attributes {dimension_semantics = [#tpu.dimension_semantics<parallel>, #tpu.dimension_semantics<parallel>, #tpu.dimension_semantics<arbitrary>], iteration_bounds = array<i64: 2, 2, 2>, scalar_prefetch = 0 : i64, scratch_operands = 4 : i64, tpu.core_type = #tpu.core_type<tc>, window_params = [{transform_indices = @transform_0, window_bounds = array<i64: 1, 32, 128>}, {transform_indices = @transform_1, window_bounds = array<i64: 1, 4, 128>}, {transform_indices = @transform_2, window_bounds = array<i64: 1, 32, 128>}, {pipeline_mode = #tpu.pipeline_mode<synchronous>, transform_indices = @transform_3, window_bounds = array<i64: 4, 32>}, {pipeline_mode = #tpu.pipeline_mode<synchronous>, transform_indices = @transform_4, window_bounds = array<i64: 4, 1>}, {transform_indices = @transform_5, window_bounds = array<i64: 1>}, {transform_indices = @transform_6, window_bounds = array<i64: 1, 32, 128>}]} {
    %c0_i32 = arith.constant 0 : i32
    %0 = arith.cmpi eq, %arg2, %c0_i32 : i32
    %1 = arith.extui %0 : i1 to i32
    %c0_i32_0 = arith.constant 0 : i32
    %2 = arith.cmpi ne, %1, %c0_i32_0 : i32
    scf.if %2 {
      %cst_24 = arith.constant 0xFF800000 : f32
      %35 = vector.broadcast %cst_24 : f32 to vector<1x128xf32>
      %c0_25 = arith.constant 0 : index
      %c0_26 = arith.constant 0 : index
      %36 = vector.load %arg11[%c0_25, %c0_26] : memref<1x128xf32, #tpu.memory_space<vmem>>, vector<1x128xf32>
      tpu.vector_store %arg11[%c0_25, %c0_26], %35 {strides = array<i32>} : memref<1x128xf32, #tpu.memory_space<vmem>>, vector<1x128xf32>,
      %cst_27 = arith.constant 0.000000e+00 : f32
      %37 = vector.broadcast %cst_27 : f32 to vector<1x128xf32>
      %c0_28 = arith.constant 0 : index
      %c0_29 = arith.constant 0 : index
      %38 = vector.load %arg12[%c0_28, %c0_29] : memref<1x128xf32, #tpu.memory_space<vmem>>, vector<1x128xf32>
      tpu.vector_store %arg12[%c0_28, %c0_29], %37 {strides = array<i32>} : memref<1x128xf32, #tpu.memory_space<vmem>>, vector<1x128xf32>,
      %cst_30 = arith.constant 0.000000e+00 : f32
      %39 = vector.broadcast %cst_30 : f32 to vector<32x128xf32>
      %c0_31 = arith.constant 0 : index
      %c0_32 = arith.constant 0 : index
      %40 = vector.load %arg13[%c0_31, %c0_32] : memref<32x128xf32, #tpu.memory_space<vmem>>, vector<32x128xf32>
      tpu.vector_store %arg13[%c0_31, %c0_32], %39 {strides = array<i32>} : memref<32x128xf32, #tpu.memory_space<vmem>>, vector<32x128xf32>,
      %c0_33 = arith.constant 0 : index
      %c0_34 = arith.constant 0 : index
      %c0_35 = arith.constant 0 : index
      %41 = vector.load %arg3[%c0_33, %c0_34, %c0_35] : memref<1x32x128xf32, #tpu.memory_space<vmem>>, vector<1x32x128xf32>
      %42 = vector.shape_cast %41 : vector<1x32x128xf32> to vector<32x128xf32>
      %43 = arith.truncf %42 : vector<32x128xf32> to vector<32x128xbf16>
      %c0_36 = arith.constant 0 : index
      %c0_37 = arith.constant 0 : index
      %44 = vector.load %arg6[%c0_36, %c0_37] : memref<4x32xbf16, #tpu.memory_space<vmem>>, vector<4x32xbf16>
      %cst_38 = arith.constant dense<0.000000e+00> : vector<4x128xf32>
      %45 = tpu.matmul %44, %43, %cst_38 {dimension_numbers = #tpu.dot_dimension_numbers<[1], [0], [0], [1], [0, 0, 1, 1], [], []>} : vector<4x32xbf16>, vector<32x128xbf16>, vector<4x128xf32> -> vector<4x128xf32>
      %c0_39 = arith.constant 0 : index
      %c0_40 = arith.constant 0 : index
      %46 = vector.load %arg7[%c0_39, %c0_40] : memref<4x1xf32, #tpu.memory_space<vmem>>, vector<4x1xf32>
      %47 = vector.broadcast %46 : vector<4x1xf32> to vector<4x128xf32>
      %48 = arith.addf %45, %47 : vector<4x128xf32>
      %49 = arith.truncf %48 : vector<4x128xf32> to vector<4x128xbf16>
      %c0_41 = arith.constant 0 : index
      %c0_42 = arith.constant 0 : index
      %50 = vector.load %arg10[%c0_41, %c0_42] : memref<4x128xbf16, #tpu.memory_space<vmem>>, vector<4x128xbf16>
      tpu.vector_store %arg10[%c0_41, %c0_42], %49 {strides = array<i32>} : memref<4x128xbf16, #tpu.memory_space<vmem>>, vector<4x128xbf16>,
    } else {
    }
    %c0 = arith.constant 0 : index
    %c0_1 = arith.constant 0 : index
    %c0_2 = arith.constant 0 : index
    %3 = vector.load %arg4[%c0, %c0_1, %c0_2] : memref<1x4x128xbf16, #tpu.memory_space<vmem>>, vector<1x4x128xbf16>
    %4 = vector.shape_cast %3 : vector<1x4x128xbf16> to vector<4x128xbf16>
    %c0_3 = arith.constant 0 : index
    %c0_4 = arith.constant 0 : index
    %c0_5 = arith.constant 0 : index
    %5 = vector.load %arg5[%c0_3, %c0_4, %c0_5] : memref<1x32x128xbf16, #tpu.memory_space<vmem>>, vector<1x32x128xbf16>
    %6 = vector.shape_cast %5 : vector<1x32x128xbf16> to vector<32x128xbf16>
    %c0_6 = arith.constant 0 : index
    %c0_7 = arith.constant 0 : index
    %7 = vector.load %arg10[%c0_6, %c0_7] : memref<4x128xbf16, #tpu.memory_space<vmem>>, vector<4x128xbf16>
    %cst = arith.constant dense<0.000000e+00> : vector<128x128xf32>
    %8 = tpu.matmul %4, %7, %cst {dimension_numbers = #tpu.dot_dimension_numbers<[0], [0], [1], [1], [0, 1, 1, 1], [], []>} : vector<4x128xbf16>, vector<4x128xbf16>, vector<128x128xf32> -> vector<128x128xf32>
    %c0_8 = arith.constant 0 : index
    %c0_9 = arith.constant 0 : index
    %9 = vector.load %arg11[%c0_8, %c0_9] : memref<1x128xf32, #tpu.memory_space<vmem>>, vector<1x128xf32>
    %cst_10 = arith.constant dense<0xFF800000> : vector<128xf32>
    %10 = vector.multi_reduction <maximumf>, %8, %cst_10 [0] : vector<128x128xf32> to vector<128xf32>
    %11 = vector.shape_cast %10 : vector<128xf32> to vector<1x128xf32>
    %12 = arith.maximumf %9, %11 : vector<1x128xf32>
    %13 = arith.subf %9, %12 : vector<1x128xf32>
    %14 = math.exp %13 : vector<1x128xf32>
    %15 = vector.broadcast %12 : vector<1x128xf32> to vector<128x128xf32>
    %16 = arith.subf %8, %15 : vector<128x128xf32>
    %17 = math.exp %16 : vector<128x128xf32>
    %c0_11 = arith.constant 0 : index
    %c0_12 = arith.constant 0 : index
    %18 = vector.load %arg12[%c0_11, %c0_12] : memref<1x128xf32, #tpu.memory_space<vmem>>, vector<1x128xf32>
    %19 = arith.mulf %14, %18 : vector<1x128xf32>
    %cst_13 = arith.constant dense<0.000000e+00> : vector<128xf32>
    %20 = vector.multi_reduction <add>, %17, %cst_13 [0] : vector<128x128xf32> to vector<128xf32>
    %21 = vector.shape_cast %20 : vector<128xf32> to vector<1x128xf32>
    %22 = arith.addf %19, %21 : vector<1x128xf32>
    %c0_14 = arith.constant 0 : index
    %c0_15 = arith.constant 0 : index
    %23 = vector.load %arg12[%c0_14, %c0_15] : memref<1x128xf32, #tpu.memory_space<vmem>>, vector<1x128xf32>
    tpu.vector_store %arg12[%c0_14, %c0_15], %22 {strides = array<i32>} : memref<1x128xf32, #tpu.memory_space<vmem>>, vector<1x128xf32>,
    %c0_16 = arith.constant 0 : index
    %c0_17 = arith.constant 0 : index
    %24 = vector.load %arg13[%c0_16, %c0_17] : memref<32x128xf32, #tpu.memory_space<vmem>>, vector<32x128xf32>
    %25 = vector.broadcast %14 : vector<1x128xf32> to vector<32x128xf32>
    %26 = arith.mulf %25, %24 : vector<32x128xf32>
    %27 = arith.truncf %17 : vector<128x128xf32> to vector<128x128xbf16>
    %cst_18 = arith.constant dense<0.000000e+00> : vector<32x128xf32>
    %28 = tpu.matmul %6, %27, %cst_18 {dimension_numbers = #tpu.dot_dimension_numbers<[1], [0], [0], [1], [0, 0, 1, 1], [], []>} : vector<32x128xbf16>, vector<128x128xbf16>, vector<32x128xf32> -> vector<32x128xf32>
    %29 = arith.addf %26, %28 : vector<32x128xf32>
    %c0_19 = arith.constant 0 : index
    %c0_20 = arith.constant 0 : index
    %30 = vector.load %arg13[%c0_19, %c0_20] : memref<32x128xf32, #tpu.memory_space<vmem>>, vector<32x128xf32>
    tpu.vector_store %arg13[%c0_19, %c0_20], %29 {strides = array<i32>} : memref<32x128xf32, #tpu.memory_space<vmem>>, vector<32x128xf32>,
    %c0_21 = arith.constant 0 : index
    %c0_22 = arith.constant 0 : index
    %31 = vector.load %arg11[%c0_21, %c0_22] : memref<1x128xf32, #tpu.memory_space<vmem>>, vector<1x128xf32>
    tpu.vector_store %arg11[%c0_21, %c0_22], %12 {strides = array<i32>} : memref<1x128xf32, #tpu.memory_space<vmem>>, vector<1x128xf32>,
    %c1_i32 = arith.constant 1 : i32
    %32 = arith.cmpi eq, %arg2, %c1_i32 : i32
    %33 = arith.extui %32 : i1 to i32
    %c0_i32_23 = arith.constant 0 : i32
    %34 = arith.cmpi ne, %33, %c0_i32_23 : i32
    scf.if %34 {
      %c0_24 = arith.constant 0 : index
      %c0_25 = arith.constant 0 : index
      %35 = vector.load %arg13[%c0_24, %c0_25] : memref<32x128xf32, #tpu.memory_space<vmem>>, vector<32x128xf32>
      %c0_26 = arith.constant 0 : index
      %c0_27 = arith.constant 0 : index
      %36 = vector.load %arg12[%c0_26, %c0_27] : memref<1x128xf32, #tpu.memory_space<vmem>>, vector<1x128xf32>
      %37 = tpu.reciprocal %36 {approx = true} : vector<1x128xf32> -> vector<1x128xf32>
      %38 = vector.broadcast %37 : vector<1x128xf32> to vector<32x128xf32>
      %39 = arith.mulf %35, %38 : vector<32x128xf32>
      %c0_28 = arith.constant 0 : index
      %40 = memref.load %arg8[%c0_28] : memref<1xf32, #tpu.memory_space<smem>>
      %41 = vector.broadcast %40 : f32 to vector<32x128xf32>
      %42 = arith.mulf %41, %39 : vector<32x128xf32>
      %c0_29 = arith.constant 0 : index
      %c0_30 = arith.constant 0 : index
      %c0_31 = arith.constant 0 : index
      %43 = vector.load %arg3[%c0_29, %c0_30, %c0_31] : memref<1x32x128xf32, #tpu.memory_space<vmem>>, vector<1x32x128xf32>
      %44 = vector.shape_cast %43 : vector<1x32x128xf32> to vector<32x128xf32>
      %45 = arith.addf %42, %44 : vector<32x128xf32>
      %c0_32 = arith.constant 0 : index
      %c0_33 = arith.constant 0 : index
      %c0_34 = arith.constant 0 : index
      %46 = vector.load %arg9[%c0_32, %c0_33, %c0_34] : memref<1x32x128xf32, #tpu.memory_space<vmem>>, vector<1x32x128xf32>
      %47 = vector.shape_cast %46 : vector<1x32x128xf32> to vector<32x128xf32>
      %48 = vector.shape_cast %45 : vector<32x128xf32> to vector<1x32x128xf32>
      tpu.vector_store %arg9[%c0_32, %c0_33, %c0_34], %48 {strides = array<i32>} : memref<1x32x128xf32, #tpu.memory_space<vmem>>, vector<1x32x128xf32>,
    } else {
    }
    return
  }
  func.func @transform_0(%arg0: i32, %arg1: i32, %arg2: i32) -> (i32, i32, i32) {
    %c0_i32 = arith.constant 0 : i32
    %c0_i32_0 = arith.constant 0 : i32
    return %arg0, %c0_i32, %arg1 : i32, i32, i32
  }
  func.func @transform_1(%arg0: i32, %arg1: i32, %arg2: i32) -> (i32, i32, i32) {
    %c0_i32 = arith.constant 0 : i32
    %c0_i32_0 = arith.constant 0 : i32
    return %arg0, %c0_i32, %arg2 : i32, i32, i32
  }
  func.func @transform_2(%arg0: i32, %arg1: i32, %arg2: i32) -> (i32, i32, i32) {
    %c0_i32 = arith.constant 0 : i32
    %c0_i32_0 = arith.constant 0 : i32
    return %arg0, %c0_i32, %arg2 : i32, i32, i32
  }
  func.func @transform_3(%arg0: i32, %arg1: i32, %arg2: i32) -> (i32, i32) {
    %c0_i32 = arith.constant 0 : i32
    %c0_i32_0 = arith.constant 0 : i32
    %c0_i32_1 = arith.constant 0 : i32
    return %c0_i32, %c0_i32_0 : i32, i32
  }
  func.func @transform_4(%arg0: i32, %arg1: i32, %arg2: i32) -> (i32, i32) {
    %c0_i32 = arith.constant 0 : i32
    %c0_i32_0 = arith.constant 0 : i32
    %c0_i32_1 = arith.constant 0 : i32
    return %c0_i32, %c0_i32_0 : i32, i32
  }
  func.func @transform_5(%arg0: i32, %arg1: i32, %arg2: i32) -> i32 {
    %c0_i32 = arith.constant 0 : i32
    %c0_i32_0 = arith.constant 0 : i32
    return %c0_i32 : i32
  }
  func.func @transform_6(%arg0: i32, %arg1: i32, %arg2: i32) -> (i32, i32, i32) {
    %c0_i32 = arith.constant 0 : i32
    %c0_i32_0 = arith.constant 0 : i32
    return %arg0, %c0_i32, %arg1 : i32, i32, i32
  }
}

</mosaic_0001>

<bundles_post_ra>
// kernel: sa_forward.2
= control target key start
LH: loop header
LB: loop body
LE: loop exit
PB: predicated region body
PF: predicated region fallthrough
CT: control target
= control target key end

     0   :  { %s909_s21 = smov 0   ;;  %s911_s22 = smov 0   ;;  %s1043_s0 = inlined_call_operand.vmem [shape: f32[2,32,256], index: 0, kind: input, shape index: {}]   ;;  %s1044_s1 = inlined_call_operand.vmem [shape: bf16[4,32], index: 1, kind: input, shape index: {}]   ;;  %s1045_s2 = inlined_call_operand.vmem [shape: f32[4,1], index: 2, kind: input, shape index: {}]   ;;  %s1046_s3 = inlined_call_operand.vmem [shape: bf16[32,32], index: 3, kind: input, shape index: {}]   ;;  %s1047_s4 = inlined_call_operand.vmem [shape: f32[32,1], index: 4, kind: input, shape index: {}]   ;;  %s1048_s5 = inlined_call_operand.vmem [shape: bf16[2,4,256], index: 5, kind: output, shape index: {0}]   ;;  %s1049_s6 = inlined_call_operand.vmem [shape: bf16[2,32,256], index: 6, kind: output, shape index: {1}]  }
   0x1   :  { %s913_s23 = smov 0   ;;  %s915_s24 = smov 0  }
   0x2   :  { %s917_s25 = smov 0   ;;  %s919_s26 = smov 0  }
   0x3   :  { %s921_s27 = smov 0  }
   0x4 LB: > { %s26_s28 = sadd.s32 1, %s861_s25  ;;  %s29_s29 = sadd.s32 1, %s865_s26  ;;  %s869_s27 = sphi %s921_s27, %s17_s27   ;;  %s865_s26 = sphi %s919_s26, %s1056_s26   ;;  %s861_s25 = sphi %s917_s25, %s1055_s25   ;;  %s857_s24 = sphi %s915_s24, %s1054_s24   ;;  %s853_s23 = sphi %s913_s23, %s1053_s23   ;;  %s849_s22 = sphi %s911_s22, %s1052_s22   ;;  %s845_s21 = sphi %s909_s21, %s1051_s21  }
   0x5   : > { %p27_p0 = scmp.ge.s32.totalorder %s26_s28, 2  ;;  %s688_s30 = sadd.s32 4294967295, %s869_s27  }
   0x6   : > { %p45_p1 = scmp.ne.s32.totalorder %s849_s22, %s845_s21  ;;  %p46_p2 = scmp.eq.s32.totalorder %s869_s27, 0 }
   0x7   : > { %s1058_s28 = smov (%p27_p0, %s26_s28), 0  ;;  %s1060_s29 = smov (!%p27_p0, %s29_s29), %s865_s26 }
   0x8   : > { %p31_p3 = scmp.ge.s32.totalorder %s1060_s29, 2  ;;  %p189_p4 = scmp.eq.s32.totalorder %s688_s30, 3 }
   0x9   : > { %s34_s7 = ssub.s32 %s861_s25, %s1058_s28  ;;  %p47_p5 = por %p46_p2, %p45_p1 }
   0xa   : > { %s1062_s29 = smov (%p31_p3, %s1060_s29), 0  ;;  %p957_p6 = por %p189_p4, %p45_p1 }
   0xb   : > { %s33_s9 = ssub.s32 %s865_s26, %s1062_s29  ;;  %s38_s11 = sadd.s32 1, %s849_s22 }
   0xc   : > { %s35_s10 = sor.u32 %s34_s7, %s33_s9  ;;  %p691_p8 = scmp.ge.s32.totalorder %s869_s27, 4 }
   0xd   : > { %p36_p7 = scmp.eq.s32.totalorder %s35_s10, 0 }
   0xe   : > { %223 = sbr.rel (%p691_p8) target bundleno = 27 (0x1b), region = 32 }
   0xf   : > { %s965_s12 = scalar_select %p36_p7, %s849_s22, %s38_s11  }
  0x13   : > { %226 = sbr.rel (!%p47_p5) target bundleno = 27 (0x1b), region = 36  ;;  %s228_s13 = sand.u32 (%p47_p5), 1, %s849_s22  }
  0x14   : > { %s693_s14 = sshll.u32 (%p47_p5), %s865_s26, 3  ;;  %s692_s15 = sshll.u32 (%p47_p5), %s228_s13, 5 }
  0x15   : > { %s232_s16 = sadd.s32 (%p47_p5), %s861_s25, %s693_s14  ;;  %s230_s30 = scalar_lea.vmem (%p47_p5), [#allocation2], %s692_s15 }
  0x16   : > { %s694_s17 = sshll.u32 (%p47_p5), %s232_s16, 3 }
  0x17   : > { %s234_s20 = scalar_lea.vmem (%p47_p5), %s1043_s0, %s694_s17 }
  0x18   : > { %v269_v0 = vld [vmem:[%s234_s20] sm:$0xff]  ;;  %v271_v1 = vld [vmem:[%s234_s20 + $0x10] sm:$0xff] }
  0x19   : > { %v273_v2 = vld [vmem:[%s234_s20 + $0x20] sm:$0xff]  ;;  %270 = vst [vmem:[%s230_s30] sm:$0xff] %v269_v0  ;;  %272 = vst [vmem:[%s230_s30 + $0x8] sm:$0xff] %v271_v1  ;;  %v275_v3 = vld [vmem:[%s234_s20 + $0x30] sm:$0xff] }
  0x1a   : > { %274 = vst [vmem:[%s230_s30 + $0x10] sm:$0xff] %v273_v2  ;;  %276 = vst [vmem:[%s230_s30 + $0x18] sm:$0xff] %v275_v3 }
  0x1b PF: > { %p695_p9 = scmp.ge.s32.totalorder %s869_s27, 1  ;;  %p281_p10 = scmp.lt.s32.totalorder %s869_s27, 5 }
  0x1d   : > { %p282_p11 = pnand %p695_p9, %p281_p10 }
  0x1e   : > { %s288_s7 = sand.u32 (!%p282_p11), 1, %s845_s21   ;;  %p324_p12 = scmp.lt.s32.totalorder (!%p282_p11), %s857_s24, 1 }
  0x1f   : > { %285 = sbr.rel (%p282_p11) target bundleno = 260 (0x104), region = 74  ;;  %s696_s9 = sshll.u32 (!%p282_p11), %s288_s7, 5 }
  0x20   : > { %s290_s13 = scalar_lea.vmem (!%p282_p11), [#allocation2], %s696_s9  ;;  %p326_p13 = scmp.lt.s32.totalorder (!%p282_p11), %s853_s23, 1 }
  0x21   : > { %s697_s11 = sshll.u32 (!%p282_p11), %s288_s7, 4 }
  0x24   : > { %vm346_vm0 = vcmask 261120   ;;  %v871_v4 = vmov 0.0   ;;  %vm872_vm1 = vmmov 0   ;;  %v813_v5 = vld [vmem:[%s1046_s3] sm:$0xff]   ;;  %v335_v6 = vld [vmem:[%s290_s13 + $0x10] sm:$0xff]  ;;  %v336_v7 = vld [vmem:[%s290_s13 + $0x18] sm:$0xff] }
  0x25   : > { %736 = vmatprep.subr.bf16.mxu0 %v871_v4  ;;  %740 = vmatprep.mubr.msk.bf16.mxu0 %vm872_vm1, %v871_v4  ;;  %v333_v8 = vld [vmem:[%s290_s13] sm:$0xff]  ;;  %v338_v9 = vpack.c.bf16 %v336_v7, %v335_v6  ;;  %v334_v10 = vld [vmem:[%s290_s13 + $0x8] sm:$0xff]  ;;  %v873_v11 = vmov 0   ;;  %v396_v16 = vld [vmem:[%s1047_s4 + $0x10] sm:$0xff]  ;;  %s325_s16 = scalar_select %p324_p12, %s857_s24, 1 }
  0x26   : > { %748 = vmatprep.mubr.msk.bf16.mxu1 %vm346_vm0, %v813_v5  ;;  %811 = vset.pattern.permute.xlu0 %v873_v11  ;;  %v340_v12 = vld [vmem:[%s1045_s2] sm:$0xf]  ;;  %v337_v13 = vpack.c.bf16 %v334_v10, %v333_v8  ;;  %v395_v14 = vld [vmem:[%s1047_s4 + $0x8] sm:$0xff]  ;;  %v397_v19 = vld [vmem:[%s1047_s4 + $0x18] sm:$0xff]  ;;  %s327_s17 = scalar_select %p326_p13, %s853_s23, 1 }
  0x27   : > { %812 = vset.pattern.permute.xlu1 %v873_v11  ;;  %343 = vperm.xlu0 %811, %v340_v12   ;;  %v394_v15 = vld [vmem:[%s1047_s4] sm:$0xff]  ;;  %v814_v18 = vld [vmem:[%s1046_s3 + $0x8] sm:$0xff]   ;;  %s698_s18 = sshll.u32 %s325_s16, 1  ;;  %s323_s13 = scalar_lea.vmem [#allocation3], %s697_s11 }
  0x28   : > { %737 = vmatpush3.bf16.msra.mxu0 %v338_v9  ;;  %744 = vmatprep.subr.bf16.mxu1 %v338_v9  ;;  %v339_v17 = vld [vmem:[%s1044_s1] sm:$0x3]  ;;  %s329_s19 = sadd.s32 %s698_s18, %s327_s17  ;;  %s710_s21 = sshll.u32 (%p957_p6), %s857_s24, 3 }
  0x29   : > { %745 = vmatpush3.bf16.msra.mxu1 %v338_v9  ;;  %738 = vmatprep.subr.bf16.mxu0 %v871_v4  ;;  %s699_s20 = sshll.u32 %s329_s19, 1  ;;  %s524_s7 = sadd.s32 (%p957_p6), %s853_s23, %s710_s21 }
  0x2a   : > { %746 = vmatprep.subr.bf16.mxu1 %v337_v13  ;;  %405 = vperm.xlu1 %812, %v395_v14   ;;  %s331_s10 = scalar_lea.vmem %s1048_s5, %s699_s20  ;;  %s711_s14 = sshll.u32 (%p957_p6), %s524_s7, 2 }
  0x2b   : > { %400 = vperm.xlu0 %811, %v394_v15   ;;  %s526_s17 = scalar_lea.vmem (%p957_p6), %s1049_s6, %s711_s14 }
  0x2c   : > { %739 = vmatpush3.bf16.msra.mxu0 %v337_v13 }
  0x2d   : > { %747 = vmatpush3.bf16.msra.mxu1 %v337_v13 }
  0x2e   : > { %410 = vperm.xlu1 %812, %v396_v16  }
  0x2f   : > { %741 = vmatmul.mubr.msk.bf16.vlgmr.msra.gmra.mxu0 %vm346_vm0, %v339_v17  ;;  %415 = vperm.xlu0 %811, %v397_v19  }
  0x30   : > { %749 = vmatmul.mubr.msk.bf16.vlgmr.msra.gmra.mxu1 %vm346_vm0, %v814_v18 }
  0xa2   : > { %v344_v20 = vpop.permute.xlu0 %343 }
  0xa5   : > { %v406_v21 = vpop.permute.xlu1 %405 }
  0xa6   : > { %v401_v22 = vpop.permute.xlu0 %400 }
  0xa9   : > { %v411_v28 = vpop.permute.xlu1 %410 }
  0xaa   : > { %v416_v31 = vpop.permute.xlu0 %415 }
  0xef   : > { %v384_v23 = vpop.f32.mrf.mxu0 }
  0xf0   : > { %v385_v24 = vadd.f32 %v384_v23, %v344_v20  ;;  %v750_v25 = vpop.f32.mrf.mxu1 }
  0xf1   : > { %v742_v26 = vpop.f32.mrf.mxu0  ;;  %v477_v33 = vadd.f32 %v750_v25, %v411_v28 }
  0xf2   : > { %v483_v27 = vpack.c.bf16 %v385_v24, %v385_v24  ;;  %v468_v29 = vpop.f32.mrf.mxu1 }
  0xf3   : > { %v387_v30 = vpop.f32.mrf.mxu0  ;;  %v469_v37 = vadd.f32 %v468_v29, %v401_v22 }
  0xf4   : > { %484 = vst [vmem:[%s331_s10] sm:$0x3] %v483_v27  ;;  %v751_v32 = vpop.f32.mrf.mxu1 }
  0xf5   : > { %v480_v34 = vadd.f32 %v751_v32, %v416_v31  ;;  %v743_v35 = vpop.f32.mrf.mxu0 }
  0xf6   : > { %v471_v36 = vpop.f32.mrf.mxu1 }
  0xf7   : > { %v726_v38 = vpack.c.bf16 %v480_v34, %v477_v33  ;;  %v472_v39 = vadd.f32 %v471_v36, %v406_v21  ;;  %522 = sbr.rel (!%p957_p6) target bundleno = 260 (0x104), region = 86 }
  0xf9   : > { %728 = vst [vmem:[%s323_s13 + $0x8] sm:$0xff] %v726_v38   ;;  %v721_v40 = vpack.c.bf16 %v472_v39, %v469_v37 }
  0xfb   : > { %722 = vst [vmem:[%s323_s13] sm:$0xff] %v721_v40  }
 0x100   : > { %v547_v43 = vld [vmem:[%s323_s13 + $0x8] sm:$0xf]  ;;  %v549_v44 = vld [vmem:[%s323_s13 + $0xc] sm:$0xf] }
 0x101   : > { %548 = vst [vmem:[%s526_s17 + $0x10] sm:$0xf] %v547_v43  ;;  %550 = vst [vmem:[%s526_s17 + $0x18] sm:$0xf] %v549_v44 }
 0x102   : > { %v543_v41 = vld [vmem:[%s323_s13] sm:$0xf]  ;;  %v545_v42 = vld [vmem:[%s323_s13 + $0x4] sm:$0xf] }
 0x103   : > { %544 = vst [vmem:[%s526_s17] sm:$0xf] %v543_v41  ;;  %546 = vst [vmem:[%s526_s17 + $0x8] sm:$0xf] %v545_v42 }
 0x104 PF: > { %s17_s27 = sadd.s32 1, %s869_s27   ;;  %s1051_s21 = smov %s849_s22 }
 0x105   : > { %p14_p0 = scmp.ge.s32.totalorder %s17_s27, 6   ;;  %s1052_s22 = smov %s965_s12 }
 0x106   : > { %s1053_s23 = smov %s861_s25  ;;  %s1054_s24 = smov %s865_s26 }
 0x107   : > { %s1055_s25 = smov %s1058_s28  ;;  %s1056_s26 = smov %s1062_s29 }
 0x108   :  { %16 = sbr.rel (!%p14_p0) target bundleno = 4 (0x4), region = 166 }

// kernel: sa_forward.3
= control target key start
LH: loop header
LB: loop body
LE: loop exit
PB: predicated region body
PF: predicated region fallthrough
CT: control target
= control target key end

     0   :  { %s1692_s0 = inlined_call_operand.vmem [shape: f32[2,32,256], index: 0, kind: input, shape index: {}]   ;;  %s1693_s1 = inlined_call_operand.vmem [shape: bf16[2,4,256], index: 1, kind: input, shape index: {}]   ;;  %s1694_s2 = inlined_call_operand.vmem [shape: bf16[2,32,256], index: 2, kind: input, shape index: {}]   ;;  %s1695_s3 = inlined_call_operand.vmem [shape: bf16[4,32], index: 3, kind: input, shape index: {}]   ;;  %s1696_s4 = inlined_call_operand.vmem [shape: f32[4,1], index: 4, kind: input, shape index: {}]   ;;  %s1697_s5 = inlined_call_operand.<no memory space> [shape: f32[1], index: 5, kind: input, shape index: {}]   ;;  %s1698_s6 = inlined_call_operand.vmem [shape: f32[2,32,256], index: 6, kind: output, shape index: {}]  }
   0x1   :  { %1702 = sst [smem:[#allocation13_spill]] %s1692_s0 }
   0x2   :  { %1703 = sst [smem:[#allocation14_spill]] %s1698_s6 }
   0x3   :  { %11 = sst [smem:[#allocation6]] %s1697_s5 }
   0x4   :  { %s1419_s23 = smov 0   ;;  %s1421_s24 = smov 0  }
   0x5   :  { %s1423_s25 = smov 0   ;;  %s1425_s26 = smov 0  }
   0x6   :  { %s1427_s27 = smov 0   ;;  %s1429_s28 = smov 0  }
   0x7   :  { %s1431_s29 = smov 0   ;;  %s1433_s30 = smov 0  }
   0x8   :  { %s1435_s7 = smov 0   ;;  %s1437_s8 = smov 0  }
   0x9   :  { %s1439_s5 = smov 0  }
   0xa LB: > { %s29_s9 = sadd.s32 1, %s1363_s30  ;;  %s32_s10 = sadd.s32 1, %s1367_s7  ;;  %s1375_s5 = sphi %s1439_s5, %s17_s5   ;;  %s1371_s8 = sphi %s1437_s8, %s1724_s8   ;;  %s1367_s7 = sphi %s1435_s7, %s1723_s7   ;;  %s1363_s30 = sphi %s1433_s30, %s1722_s30   ;;  %s1359_s29 = sphi %s1431_s29, %s1721_s29   ;;  %s1355_s28 = sphi %s1429_s28, %s1720_s28   ;;  %s1351_s27 = sphi %s1427_s27, %s1719_s27   ;;  %s1347_s26 = sphi %s1425_s26, %s1718_s26   ;;  %s1343_s25 = sphi %s1423_s25, %s1717_s25   ;;  %s1339_s24 = sphi %s1421_s24, %s1716_s24   ;;  %s1335_s23 = sphi %s1419_s23, %s1715_s23  }
   0xb   : > { %p30_p0 = scmp.ge.s32.totalorder %s29_s9, 2  ;;  %p52_p1 = scmp.ne.s32.totalorder %s1347_s26, %s1343_s25 }
   0xc   : > { %p53_p2 = scmp.eq.s32.totalorder %s1375_s5, 0  ;;  %s36_s11 = sadd.s32 1, %s1371_s8 }
   0xd   : > { %s1726_s9 = smov (%p30_p0, %s29_s9), 0  ;;  %s1728_s10 = smov (!%p30_p0, %s32_s10), %s1367_s7 }
   0xe   : > { %1704 = sst [smem:[#allocation10_spill]] %s1726_s9  ;;  %p34_p3 = scmp.ge.s32.totalorder %s1728_s10, 2 }
   0xf   : > { %s1054_s12 = sadd.s32 4294967295, %s1375_s5   ;;  %p1487_p4 = por %p53_p2, %p52_p1 }
  0x10   : > { %s1730_s10 = smov (%p34_p3, %s1728_s10), 0  ;;  %s1732_s11 = smov (!%p34_p3, %s36_s11), %s1371_s8 }
  0x11   : > { %1706 = sst [smem:[#allocation11_spill]] %s1730_s10  ;;  %s97_s14 = ssub.s32 %s1363_s30, %s1726_s9 }
  0x12   : > { %p108_p5 = scmp.ne.s32.totalorder %s1339_s24, %s1335_s23  ;;  %p38_p6 = scmp.ge.s32.totalorder %s1732_s11, 2 }
  0x13   : > { %p203_p7 = scmp.eq.s32.totalorder %s1054_s12, 7  ;;  %s41_s15 = ssub.s32 %s1367_s7, %s1730_s10 }
  0x14   : > { %p1500_p8 = por %p108_p5, %p53_p2  ;;  %s1734_s11 = smov (%p38_p6, %s1732_s11), 0 }
  0x15   : > { %1708 = sst [smem:[#allocation12_spill]] %s1734_s11  ;;  %s45_s17 = sadd.s32 1, %s1347_s26 }
  0x16   : > { %p1510_p9 = por %p203_p7, %p52_p1  ;;  %s40_s19 = ssub.s32 %s1371_s8, %s1734_s11 }
  0x17   : > { %s101_s20 = sadd.s32 1, %s1339_s24  ;;  %s42_s21 = sor.u32 %s41_s15, %s40_s19 }
  0x18   : > { %s98_s22 = sor.u32 %s97_s14, %s40_s19  ;;  %p43_p10 = scmp.eq.s32.totalorder %s42_s21, 0 }
  0x19   : > { %p99_p11 = scmp.eq.s32.totalorder %s98_s22, 0  ;;  %p1057_p12 = scmp.ge.s32.totalorder %s1375_s5, 8 }
  0x1a   : > { %s1518_s12 = scalar_select %p43_p10, %s1347_s26, %s45_s17  }
  0x1b   : > { %s1521_s10 = scalar_select %p99_p11, %s1339_s24, %s101_s20  }
  0x1c   : > { %234 = sbr.rel (%p1057_p12) target bundleno = 53 (0x35), region = 28 }
  0x21   : > { %237 = sbr.rel (!%p1487_p4) target bundleno = 45 (0x2d), region = 32  ;;  %s239_s9 = sand.u32 (%p1487_p4), 1, %s1347_s26  }
  0x22   : > { %s1059_s11 = sshll.u32 (%p1487_p4), %s1371_s8, 3  ;;  %s1058_s6 = sshll.u32 (%p1487_p4), %s239_s9, 5 }
  0x23   : > { %s243_s15 = sadd.s32 (%p1487_p4), %s1367_s7, %s1059_s11  ;;  %s1710_s0 = sld [smem:[#allocation13_spill]] (%p1487_p4) }
  0x24   : > { %s1060_s14 = sshll.u32 (%p1487_p4), %s243_s15, 3  ;;  %s241_s20 = scalar_lea.vmem (%p1487_p4), [#allocation7], %s1058_s6 }
  0x29   : > { %s245_s17 = scalar_lea.vmem %s1710_s0, %s1060_s14 }
  0x2a   : > { %v280_v0 = vld [vmem:[%s245_s17] sm:$0xff]  ;;  %v282_v1 = vld [vmem:[%s245_s17 + $0x10] sm:$0xff] }
  0x2b   : > { %v284_v2 = vld [vmem:[%s245_s17 + $0x20] sm:$0xff]  ;;  %281 = vst [vmem:[%s241_s20] sm:$0xff] %v280_v0  ;;  %283 = vst [vmem:[%s241_s20 + $0x8] sm:$0xff] %v282_v1  ;;  %v286_v3 = vld [vmem:[%s245_s17 + $0x30] sm:$0xff] }
  0x2c   : > { %285 = vst [vmem:[%s241_s20 + $0x10] sm:$0xff] %v284_v2  ;;  %287 = vst [vmem:[%s241_s20 + $0x18] sm:$0xff] %v286_v3 }
  0x2d PF: > { %304 = sbr.rel (!%p1500_p8) target bundleno = 53 (0x35), region = 74  ;;  %s306_s9 = sand.u32 (%p1500_p8), 1, %s1339_s24  }
  0x2e   : > { %s1062_s11 = sshll.u32 (%p1500_p8), %s1371_s8, 3  ;;  %s1061_s13 = sshll.u32 (%p1500_p8), %s306_s9, 4 }
  0x2f   : > { %s310_s22 = sadd.s32 (%p1500_p8), %s1363_s30, %s1062_s11  ;;  %s308_s21 = scalar_lea.vmem (%p1500_p8), [#allocation8], %s1061_s13 }
  0x30   : > { %s1063_s15 = sshll.u32 (%p1500_p8), %s310_s22, 2 }
  0x31   : > { %s312_s6 = scalar_lea.vmem (%p1500_p8), %s1694_s2, %s1063_s15 }
  0x32   : > { %v329_v4 = vld [vmem:[%s312_s6] sm:$0xf]  ;;  %v331_v5 = vld [vmem:[%s312_s6 + $0x8] sm:$0xf]  ;;  %v333_v6 = vld [vmem:[%s312_s6 + $0x10] sm:$0xf] }
  0x33   : > { %330 = vst [vmem:[%s308_s21] sm:$0xf] %v329_v4  ;;  %332 = vst [vmem:[%s308_s21 + $0x4] sm:$0xf] %v331_v5  ;;  %v335_v7 = vld [vmem:[%s312_s6 + $0x18] sm:$0xf] }
  0x34   : > { %334 = vst [vmem:[%s308_s21 + $0x8] sm:$0xf] %v333_v6  ;;  %336 = vst [vmem:[%s308_s21 + $0xc] sm:$0xf] %v335_v7 }
  0x35 PF: > { %p1064_p13 = scmp.ge.s32.totalorder %s1375_s5, 1  ;;  %p367_p0 = scmp.lt.s32.totalorder %s1375_s5, 9 }
  0x37   : > { %p368_p1 = pnand %p1064_p13, %p367_p0 }
  0x38   : > { %s374_s16 = sand.u32 (!%p368_p1), 1, %s1343_s25   ;;  %s381_s17 = sand.u32 (!%p368_p1), 1, %s1335_s23  }
  0x39   : > { %371 = sbr.rel (%p368_p1) target bundleno = 928 (0x3a0), region = 115  ;;  %s1065_s20 = sshll.u32 (!%p368_p1), %s374_s16, 5 }
  0x3a   : > { %s1544_s9 = sshll.u32 (!%p368_p1), %s381_s17, 4  ;;  %p421_p2 = scmp.lt.s32.totalorder (!%p368_p1), %s1359_s29, 1 }
  0x3b   : > { %p423_p3 = scmp.lt.s32.totalorder (!%p368_p1), %s1351_s27, 1  ;;  %s1555_s0 = scalar_lea.vmem (!%p368_p1), [#allocation7], %s1065_s20 }
  0x3c   : > { %s383_s25 = scalar_lea.vmem (!%p368_p1), [#allocation8], %s1544_s9  ;;  %s1558_s23 = scalar_lea.vmem (!%p368_p1), [#allocation9], %s1065_s20 }
  0x3d   : > { %p1070_p4 = scmp.ne.s32.totalorder (!%p368_p1), %s1351_s27, 0 }
  0x3e   : > { %s422_s11 = scalar_select %p421_p2, %s1359_s29, 1 }
  0x3f   : > { %s424_s13 = scalar_select %p423_p3, %s1351_s27, 1 }
  0x40   : > { %s1068_s22 = sshll.u32 %s422_s11, 1  ;;  %433 = sbr.rel (%p1070_p4) target bundleno = 278 (0x116), region = 127 }
  0x41   : > { %s426_s15 = sadd.s32 %s1068_s22, %s424_s13 }
  0x42   : > { %s1069_s14 = sshll.u32 %s426_s15, 1 }
  0x43   : > { %s1553_s21 = scalar_lea.vmem %s1693_s1, %s1069_s14 }
  0x45   : > { %v442_v8 = vld [vmem:[%s1555_s0 + $0x10] sm:$0xff]  ;;  %v443_v9 = vld [vmem:[%s1555_s0 + $0x18] sm:$0xff]  ;;  %v440_v10 = vld [vmem:[%s1555_s0] sm:$0xff]  ;;  %v1377_v11 = vmov -inf   ;;  %v1378_v12 = vmov 0.0   ;;  %vm1379_vm0 = vmmov 0  }
  0x46   : > { %434 = vst [vmem:[#allocation3] sm:$0x1] %v1377_v11  ;;  %435 = vst [vmem:[#allocation4] sm:$0x1] %v1378_v12  ;;  %1110 = vmatprep.subr.bf16.mxu0 %v1378_v12  ;;  %v445_v13 = vpack.c.bf16 %v443_v9, %v442_v8  ;;  %v441_v14 = vld [vmem:[%s1555_s0 + $0x8] sm:$0xff]  ;;  %1114 = vmatprep.mubr.msk.bf16.mxu0 %vm1379_vm0, %v1378_v12  ;;  %v1380_v15 = vmov 0  }
  0x47   : > { %436 = vst [vmem:[#allocation5 + $0x10] sm:$0xff] %v1378_v12  ;;  %437 = vst [vmem:[#allocation5] sm:$0xff] %v1378_v12  ;;  %1250 = vset.pattern.permute.xlu0 %v1380_v15  ;;  %v447_v16 = vld [vmem:[%s1696_s4] sm:$0xf]  ;;  %v444_v17 = vpack.c.bf16 %v441_v14, %v440_v10  ;;  %vm453_vm1 = vcmask 261120  }
  0x48   : > { %438 = vst [vmem:[#allocation5 + $0x18] sm:$0xff] %v1378_v12  ;;  %439 = vst [vmem:[#allocation5 + $0x8] sm:$0xff] %v1378_v12  ;;  %1111 = vmatpush3.bf16.msra.mxu0 %v445_v13  ;;  %450 = vperm.xlu0 %1250, %v447_v16   ;;  %v446_v18 = vld [vmem:[%s1695_s3] sm:$0x3] }
  0x49   : > { %1112 = vmatprep.subr.bf16.mxu0 %v1378_v12 }
  0x4c   : > { %1113 = vmatpush3.bf16.msra.mxu0 %v444_v17 }
  0x4f   : > { %1115 = vmatmul.mubr.msk.bf16.vlgmr.msra.gmra.mxu0 %vm453_vm1, %v446_v18 }
  0xc3   : > { %v451_v19 = vpop.permute.xlu0 %450 }
 0x10f   : > { %v491_v20 = vpop.f32.mrf.mxu0 }
 0x110   : > { %v492_v21 = vadd.f32 %v491_v20, %v451_v19 }
 0x111   : > { %v1116_v22 = vpop.f32.mrf.mxu0 }
 0x112   : > { %v497_v23 = vpack.c.bf16 %v492_v21, %v492_v21 }
 0x113   : > { %v494_v24 = vpop.f32.mrf.mxu0 }
 0x114   : > { %498 = vst [vmem:[#allocation2] sm:$0x3] %v497_v23 }
 0x115   : > { %v1117_v25 = vpop.f32.mrf.mxu0 }
 0x116 PF: > { %v499_v26 = vld [vmem:[%s1553_s21] sm:$0x3]  ;;  %vm546_vm2 = vcmask 1041408   ;;  %vm521_vm3 = vcmask 31744   ;;  %v1251_v37 = vld [vmem:[%s383_s25] sm:$0xff]   ;;  %v674_v7 = vlaneseq  ;;  %p1082_p5 = scmp.ne.s32.totalorder %s1351_s27, 1 }
 0x117   : > { %505 = vxpose.xlu0.c.b16.start.end [1/1] (short) %v499_v26, 128  ;;  %1152 = vmatprep.mubr.bf16.mxu1 %v1251_v37  ;;  %v647_v12 = vld [vmem:[#allocation3] sm:$0x1]  ;;  %s864_s9 = sld [smem:[#allocation6]] (!%p1082_p5) }
 0x118   : > { %v675_v10 = vshrl.u32 %v674_v7, 7 }
 0x11a   : > { %v1606_v14 = vsub.s32 0, %v675_v10 }
 0x11b   : > { %v504_v27 = vld [vmem:[#allocation2] sm:$0x3] }
 0x11c   : > { %1156 = vmatprep.subr.msk.bf16.mxu0 %vm546_vm2, %v504_v27  ;;  %v548_v28 = vsel %vm546_vm2, %v504_v27, 0 }
 0x11d   : > { %1119 = vmatpush3.bf16.msra.mxu0 %v548_v28 }
 0x179   : > { %v513_v29 = vpop.trf.xlu0 }
 0x17a   : > { %1120 = vmatprep.mubr.msk.bf16.mxu0 %vm521_vm3, %v513_v29 }
 0x17d   : > { %v514_v30 = vpop.trf.xlu0 }
 0x17e   : > { %1121 = vmatmul.mubr.msk.bf16.vlgmr.msra.gmra.mxu0 %vm521_vm3, %v514_v30 }
 0x181   : > { %v515_v31 = vpop.trf.xlu0 }
 0x182   : > { %1124 = vmatprep.mubr.msk.bf16.mxu0 %vm521_vm3, %v515_v31 }
 0x185   : > { %v516_v32 = vpop.trf.xlu0 }
 0x186   : > { %1125 = vmatmul.mubr.msk.bf16.gmra.mxu0 %vm521_vm3, %v516_v32 }
 0x189   : > { %v517_v33 = vpop.trf.xlu0 }
 0x18a   : > { %1128 = vmatprep.mubr.msk.bf16.mxu0 %vm521_vm3, %v517_v33 }
 0x18d   : > { %v518_v34 = vpop.trf.xlu0 }
 0x18e   : > { %1129 = vmatmul.mubr.msk.bf16.gmra.mxu0 %vm521_vm3, %v518_v34 }
 0x191   : > { %v519_v35 = vpop.trf.xlu0 }
 0x192   : > { %1132 = vmatprep.mubr.msk.bf16.mxu0 %vm521_vm3, %v519_v35 }
 0x195   : > { %v520_v36 = vpop.trf.xlu0 }
 0x196   : > { %1133 = vmatmul.mubr.msk.bf16.gmra.mxu0 %vm521_vm3, %v520_v36 }
 0x23e   : > { %v1122_v38 = vpop.f32.mrf.mxu0 }
 0x240   : > { %v584_v39 = vpop.f32.mrf.mxu0 }
 0x242   : > { %v1123_v40 = vpop.f32.mrf.mxu0 }
 0x244   : > { %v587_v41 = vpop.f32.mrf.mxu0 }
 0x246   : > { %v1582_v42 = vpop.f32.mrf.mxu0 }
 0x247   : > { %v650_v53 = vmax.f32 %v1122_v38, %v1582_v42 }
 0x248   : > { %v600_v43 = vpop.f32.mrf.mxu0 }
 0x249   : > { %v648_v54 = vmax.f32 %v584_v39, %v600_v43 }
 0x24a   : > { %v1584_v44 = vpop.f32.mrf.mxu0 }
 0x24b   : > { %v651_v51 = vmax.f32 %v1123_v40, %v1584_v44 }
 0x24c   : > { %v603_v45 = vpop.f32.mrf.mxu0 }
 0x24d   : > { %v649_v55 = vmax.f32 %v587_v41, %v603_v45 }
 0x24e   : > { %v1586_v46 = vpop.f32.mrf.mxu0 }
 0x24f   : > { %v654_v58 = vmax.f32 %v650_v53, %v1586_v46 }
 0x250   : > { %v1588_v47 = vpop.f32.mrf.mxu0 }
 0x251   : > { %v652_v59 = vmax.f32 %v648_v54, %v1588_v47 }
 0x252   : > { %v1590_v48 = vpop.f32.mrf.mxu0 }
 0x253   : > { %v655_v56 = vmax.f32 %v651_v51, %v1590_v48 }
 0x254   : > { %v1592_v49 = vpop.f32.mrf.mxu0 }
 0x255   : > { %v653_v60 = vmax.f32 %v649_v55, %v1592_v49 }
 0x256   : > { %v1594_v50 = vpop.f32.mrf.mxu0 }
 0x257   : > { %v658_v63 = vmax.f32 %v654_v58, %v1594_v50 }
 0x258   : > { %v632_v52 = vpop.f32.mrf.mxu0 }
 0x259   : > { %v656_v0 = vmax.f32 %v652_v59, %v632_v52 }
 0x25a   : > { %v1599_v57 = vpop.f32.mrf.mxu0 }
 0x25b   : > { %v659_v61 = vmax.f32 %v655_v56, %v1599_v57 }
 0x25c   : > { %v635_v62 = vpop.f32.mrf.mxu0 }
 0x25d   : > { %v657_v1 = vmax.f32 %v653_v60, %v635_v62  ;;  %v661_v2 = vmax.f32 %v658_v63, %v659_v61 }
 0x25f   : > { %v660_v3 = vmax.f32 %v656_v0, %v657_v1 }
 0x261   : > { %v662_v4 = vmax.f32 %v660_v3, %v661_v2 }
 0x263   : > { %v663_v5 = vrot.slane %v662_v4, 4 }
 0x265   : > { %v664_v6 = vmax.f32 %v662_v4, %v663_v5 }
 0x267   : > { %v665_v8 = vrot.slane %v664_v6, 2 }
 0x269   : > { %v666_v9 = vmax.f32 %v664_v6, %v665_v8 }
 0x26b   : > { %v667_v11 = vrot.slane %v666_v9, 1 }
 0x26d   : > { %v668_v13 = vmax.f32 %v666_v9, %v667_v11 }
 0x26f   : > { %v669_v15 = vmax.f32 %v647_v12, %v668_v13 }
 0x271   : > { %v670_v16 = vsub.f32 %v647_v12, %v669_v15  ;;  %v677_v17 = vrot.slane %v669_v15, %v1606_v14  ;;  %843 = vst [vmem:[#allocation3] sm:$0x1] %v669_v15 }
 0x273   : > { %v671_v18 = vmul.f32 1.442695, %v670_v16  ;;  %v679_v19 = vsub.f32 %v584_v39, %v677_v17  ;;  %v680_v20 = vsub.f32 %v587_v41, %v677_v17  ;;  %v681_v21 = vsub.f32 %v1122_v38, %v677_v17 }
 0x274   : > { %v682_v22 = vsub.f32 %v1123_v40, %v677_v17  ;;  %v683_v25 = vsub.f32 %v600_v43, %v677_v17  ;;  %v684_v27 = vsub.f32 %v603_v45, %v677_v17  ;;  %v685_v28 = vsub.f32 %v1582_v42, %v677_v17 }
 0x275   : > { %1253 = vpow2.f32 %v671_v18  ;;  %v695_v23 = vmul.f32 1.442695, %v679_v19  ;;  %v697_v24 = vmul.f32 1.442695, %v680_v20  ;;  %v699_v26 = vmul.f32 1.442695, %v681_v21 }
 0x276   : > { %v701_v29 = vmul.f32 1.442695, %v682_v22  ;;  %v686_v30 = vsub.f32 %v1584_v44, %v677_v17  ;;  %v687_v31 = vsub.f32 %v1588_v47, %v677_v17  ;;  %v703_v32 = vmul.f32 1.442695, %v683_v25 }
 0x277   : > { %1255 = vpow2.f32 %v695_v23  ;;  %v691_v33 = vsub.f32 %v632_v52, %v677_v17  ;;  %v705_v34 = vmul.f32 1.442695, %v684_v27  ;;  %v692_v35 = vsub.f32 %v635_v62, %v677_v17 }
 0x278   : > { %1257 = vpow2.f32 %v697_v24  ;;  %v707_v36 = vmul.f32 1.442695, %v685_v28  ;;  %v709_v37 = vmul.f32 1.442695, %v686_v30  ;;  %v693_v38 = vsub.f32 %v1594_v50, %v677_v17 }
 0x279   : > { %1259 = vpow2.f32 %v699_v26  ;;  %v711_v39 = vmul.f32 1.442695, %v687_v31  ;;  %v694_v40 = vsub.f32 %v1599_v57, %v677_v17  ;;  %v719_v41 = vmul.f32 1.442695, %v691_v33 }
 0x27a   : > { %1261 = vpow2.f32 %v701_v29  ;;  %v688_v43 = vsub.f32 %v1592_v49, %v677_v17  ;;  %v721_v44 = vmul.f32 1.442695, %v692_v35  ;;  %v689_v45 = vsub.f32 %v1586_v46, %v677_v17 }
 0x27b   : > { %1263 = vpow2.f32 %v703_v32  ;;  %v723_v47 = vmul.f32 1.442695, %v693_v38  ;;  %v690_v50 = vsub.f32 %v1590_v48, %v677_v17  ;;  %v725_v52 = vmul.f32 1.442695, %v694_v40  ;;  %v727_v32 = vld [vmem:[#allocation4] sm:$0x1] }
 0x27c   : > { %1265 = vpow2.f32 %v705_v34  ;;  %v713_v54 = vmul.f32 1.442695, %v688_v43  ;;  %v715_v55 = vmul.f32 1.442695, %v689_v45  ;;  %v1252_v38 = vld [vmem:[%s383_s25 + $0x8] sm:$0xff]   ;;  %v752_v40 = vld [vmem:[#allocation5 + $0x10] sm:$0xff] }
 0x27d   : > { %1267 = vpow2.f32 %v707_v36  ;;  %v717_v46 = vmul.f32 1.442695, %v690_v50  ;;  %v753_v50 = vld [vmem:[#allocation5] sm:$0xff] }
 0x27e   : > { %1269 = vpow2.f32 %v709_v37 }
 0x27f   : > { %1271 = vpow2.f32 %v711_v39  ;;  %v754_v39 = vld [vmem:[#allocation5 + $0x18] sm:$0xff] }
 0x280   : > { %1273 = vpow2.f32 %v719_v41 }
 0x281   : > { %1275 = vpow2.f32 %v721_v44  ;;  %v755_v44 = vld [vmem:[#allocation5 + $0x8] sm:$0xff] }
 0x282   : > { %v1614_v42 = vpop.eup %1253  ;;  %1277 = vpow2.f32 %v723_v47 }
 0x283   : > { %v1620_v51 = vrot.slane %v1614_v42, %v1606_v14  ;;  %1279 = vpow2.f32 %v725_v52  ;;  %v728_v34 = vmul.f32 %v1614_v42, %v727_v32 }
 0x284   : > { %v1623_v53 = vpop.eup %1255  ;;  %1281 = vpow2.f32 %v713_v54 }
 0x285   : > { %v1625_v49 = vpop.eup %1257  ;;  %1283 = vpow2.f32 %v715_v55  ;;  %v764_v41 = vmul.f32 %v1620_v51, %v754_v39  ;;  %v762_v42 = vmul.f32 %v1620_v51, %v752_v40  ;;  %v763_v55 = vmul.f32 %v1620_v51, %v753_v50 }
 0x286   : > { %v729_v56 = vadd.f32 %v1625_v49, %v1623_v53  ;;  %v1260_v57 = vpop.eup %1259  ;;  %1285 = vpow2.f32 %v717_v46  ;;  %v766_v36 = vpack.c.bf16 %v1625_v49, %v1623_v53  ;;  %v765_v53 = vmul.f32 %v1620_v51, %v755_v44 }
 0x287   : > { %v1262_v48 = vpop.eup %1261 }
 0x288   : > { %v730_v58 = vadd.f32 %v1260_v57, %v729_v56  ;;  %v1264_v60 = vpop.eup %1263  ;;  %v767_v31 = vpack.c.bf16 %v1262_v48, %v1260_v57 }
 0x289   : > { %v1266_v61 = vpop.eup %1265 }
 0x28a   : > { %v731_v59 = vadd.f32 %v1262_v48, %v730_v58  ;;  %v1268_v63 = vpop.eup %1267  ;;  %v768_v28 = vpack.c.bf16 %v1266_v61, %v1264_v60 }
 0x28b   : > { %v1270_v0 = vpop.eup %1269 }
 0x28c   : > { %v732_v62 = vadd.f32 %v1264_v60, %v731_v59  ;;  %v1272_v2 = vpop.eup %1271  ;;  %v769_v25 = vpack.c.bf16 %v1270_v0, %v1268_v63 }
 0x28d   : > { %v1274_v3 = vpop.eup %1273 }
 0x28e   : > { %v733_v1 = vadd.f32 %v1266_v61, %v732_v62  ;;  %v1276_v5 = vpop.eup %1275 }
 0x28f   : > { %v1278_v6 = vpop.eup %1277  ;;  %v772_v15 = vpack.c.bf16 %v1276_v5, %v1274_v3 }
 0x290   : > { %v734_v4 = vadd.f32 %v1268_v63, %v733_v1  ;;  %v1280_v8 = vpop.eup %1279 }
 0x291   : > { %v773_v10 = vpack.c.bf16 %v1280_v8, %v1278_v6  ;;  %v1282_v11 = vpop.eup %1281 }
 0x292   : > { %v735_v7 = vadd.f32 %v1270_v0, %v734_v4  ;;  %v1284_v12 = vpop.eup %1283  ;;  %v770_v22 = vpack.c.bf16 %v1282_v11, %v1272_v2 }
 0x293   : > { %1136 = vmatprep.subr.bf16.mxu1 %v773_v10  ;;  %v1286_v16 = vpop.eup %1285 }
 0x294   : > { %v736_v9 = vadd.f32 %v1272_v2, %v735_v7  ;;  %1137 = vmatpush3.bf16.msra.mxu1 %v773_v10  ;;  %v771_v19 = vpack.c.bf16 %v1286_v16, %v1284_v12 }
 0x295   : > { %1138 = vmatprep.subr.bf16.mxu1 %v772_v15 }
 0x296   : > { %v737_v13 = vadd.f32 %v1282_v11, %v736_v9 }
 0x298   : > { %v738_v17 = vadd.f32 %v1284_v12, %v737_v13  ;;  %1139 = vmatpush3.bf16.msra.mxu1 %v772_v15 }
 0x299   : > { %1140 = vmatprep.subr.bf16.mxu1 %v771_v19 }
 0x29a   : > { %v739_v18 = vadd.f32 %v1286_v16, %v738_v17 }
 0x29c   : > { %v740_v20 = vadd.f32 %v1274_v3, %v739_v18  ;;  %1141 = vmatpush3.bf16.msra.mxu1 %v771_v19 }
 0x29d   : > { %1142 = vmatprep.subr.bf16.mxu1 %v770_v22 }
 0x29e   : > { %v741_v21 = vadd.f32 %v1276_v5, %v740_v20 }
 0x2a0   : > { %v742_v23 = vadd.f32 %v1278_v6, %v741_v21  ;;  %1143 = vmatpush3.bf16.msra.mxu1 %v770_v22 }
 0x2a1   : > { %1144 = vmatprep.subr.bf16.mxu1 %v769_v25 }
 0x2a2   : > { %v743_v24 = vadd.f32 %v1280_v8, %v742_v23 }
 0x2a4   : > { %v744_v26 = vrot.slane %v743_v24, 4  ;;  %1145 = vmatpush3.bf16.msra.mxu1 %v769_v25 }
 0x2a5   : > { %1146 = vmatprep.subr.bf16.mxu1 %v768_v28 }
 0x2a6   : > { %v745_v27 = vadd.f32 %v744_v26, %v743_v24 }
 0x2a8   : > { %v746_v29 = vrot.slane %v745_v27, 2  ;;  %1147 = vmatpush3.bf16.msra.mxu1 %v768_v28 }
 0x2a9   : > { %1148 = vmatprep.subr.bf16.mxu1 %v767_v31 }
 0x2aa   : > { %v747_v30 = vadd.f32 %v746_v29, %v745_v27 }
 0x2ac   : > { %v748_v33 = vrot.slane %v747_v30, 1  ;;  %1149 = vmatpush3.bf16.msra.mxu1 %v767_v31 }
 0x2ad   : > { %1150 = vmatprep.subr.bf16.mxu1 %v766_v36 }
 0x2ae   : > { %v749_v35 = vadd.f32 %v748_v33, %v747_v30 }
 0x2b0   : > { %v750_v37 = vadd.f32 %v749_v35, %v728_v34  ;;  %1151 = vmatpush3.bf16.msra.mxu1 %v766_v36 }
 0x2b2   : > { %751 = vst [vmem:[#allocation4] sm:$0x1] %v750_v37 }
 0x2b3   : > { %1153 = vmatmul.mubr.bf16.vlgmr.msra.gmra.mxu1 %v1252_v38 }
 0x373   : > { %v1154_v43 = vpop.f32.mrf.mxu1 }
 0x374   : > { %v837_v45 = vadd.f32 %v1154_v43, %v764_v41 }
 0x375   : > { %v820_v47 = vpop.f32.mrf.mxu1 }
 0x376   : > { %841 = vst [vmem:[#allocation5 + $0x18] sm:$0xff] %v837_v45  ;;  %v835_v52 = vadd.f32 %v820_v47, %v762_v42 }
 0x377   : > { %v1155_v54 = vpop.f32.mrf.mxu1 }
 0x378   : > { %839 = vst [vmem:[#allocation5 + $0x10] sm:$0xff] %v835_v52  ;;  %v838_v49 = vadd.f32 %v1155_v54, %v765_v53  ;;  %847 = sbr.rel (%p1082_p5) target bundleno = 918 (0x396), region = 131 }
 0x379   : > { %v823_v46 = vpop.f32.mrf.mxu1 }
 0x37a   : > { %842 = vst [vmem:[#allocation5 + $0x8] sm:$0xff] %v838_v49  ;;  %v836_v56 = vadd.f32 %v823_v46, %v763_v55 }
 0x37c   : > { %840 = vst [vmem:[#allocation5] sm:$0xff] %v836_v56 }
 0x37d   : > { %v852_v57 = vld [vmem:[#allocation4] sm:$0x1]  ;;  %v865_v62 = vstv %s864_s9  ;;  %v870_v0 = vld [vmem:[%s1555_s0] sm:$0xff]  ;;  %v871_v4 = vld [vmem:[%s1555_s0 + $0x8] sm:$0xff] }
 0x37e   : > { %1287 = vrcp.f32 %v852_v57  ;;  %v850_v60 = vld [vmem:[#allocation5 + $0x18] sm:$0xff]  ;;  %v872_v5 = vld [vmem:[%s1555_s0 + $0x10] sm:$0xff] }
 0x37f   : > { %v848_v58 = vld [vmem:[#allocation5 + $0x10] sm:$0xff]  ;;  %v873_v6 = vld [vmem:[%s1555_s0 + $0x18] sm:$0xff] }
 0x381   : > { %v851_v61 = vld [vmem:[#allocation5 + $0x8] sm:$0xff] }
 0x383   : > { %v849_v59 = vld [vmem:[#allocation5] sm:$0xff] }
 0x38b   : > { %v1288_v48 = vpop.eup %1287 }
 0x38c   : > { %v858_v51 = vrot.slane %v1288_v48, %v1606_v14 }
 0x38e   : > { %v860_v63 = vmul.f32 %v858_v51, %v848_v58  ;;  %v861_v1 = vmul.f32 %v858_v51, %v849_v59  ;;  %v862_v2 = vmul.f32 %v858_v51, %v850_v60  ;;  %v863_v3 = vmul.f32 %v858_v51, %v851_v61 }
 0x390   : > { %v866_v7 = vmul.f32 %v865_v62, %v860_v63  ;;  %v867_v8 = vmul.f32 %v865_v62, %v861_v1  ;;  %v868_v9 = vmul.f32 %v865_v62, %v862_v2  ;;  %v869_v10 = vmul.f32 %v865_v62, %v863_v3 }
 0x392   : > { %v874_v11 = vadd.f32 %v870_v0, %v866_v7  ;;  %v875_v12 = vadd.f32 %v871_v4, %v867_v8  ;;  %v876_v14 = vadd.f32 %v872_v5, %v868_v9  ;;  %v877_v13 = vadd.f32 %v873_v6, %v869_v10 }
 0x394   : > { %878 = vst [vmem:[%s1558_s23] sm:$0xff] %v874_v11  ;;  %879 = vst [vmem:[%s1558_s23 + $0x8] sm:$0xff] %v875_v12 }
 0x395   : > { %880 = vst [vmem:[%s1558_s23 + $0x10] sm:$0xff] %v876_v14  ;;  %881 = vst [vmem:[%s1558_s23 + $0x18] sm:$0xff] %v877_v13 }
 0x396 PF: > { %888 = sbr.rel (!%p1510_p9) target bundleno = 928 (0x3a0), region = 135  ;;  %s1084_s0 = sshll.u32 (%p1510_p9), %s1359_s29, 3 }
 0x397   : > { %s890_s27 = sadd.s32 (%p1510_p9), %s1355_s28, %s1084_s0  ;;  %s1711_s14 = sld [smem:[#allocation14_spill]] (%p1510_p9) }
 0x398   : > { %s1085_s13 = sshll.u32 (%p1510_p9), %s890_s27, 3 }
 0x39b   : > { %v927_v15 = vld [vmem:[%s1558_s23] sm:$0xff]  ;;  %v929_v16 = vld [vmem:[%s1558_s23 + $0x8] sm:$0xff] }
 0x39c   : > { %v931_v17 = vld [vmem:[%s1558_s23 + $0x10] sm:$0xff]  ;;  %v933_v18 = vld [vmem:[%s1558_s23 + $0x18] sm:$0xff] }
 0x39d   : > { %s892_s19 = scalar_lea.vmem %s1711_s14, %s1085_s13 }
 0x39e   : > { %928 = vst [vmem:[%s892_s19] sm:$0xff] %v927_v15  ;;  %930 = vst [vmem:[%s892_s19 + $0x10] sm:$0xff] %v929_v16 }
 0x39f   : > { %932 = vst [vmem:[%s892_s19 + $0x20] sm:$0xff] %v931_v17  ;;  %934 = vst [vmem:[%s892_s19 + $0x30] sm:$0xff] %v933_v18 }
 0x3a0 PF: > { %s17_s5 = sadd.s32 1, %s1375_s5   ;;  %s1712_s18 = sld [smem:[#allocation10_spill]] }
 0x3a1   : > { %p14_p6 = scmp.ge.s32.totalorder %s17_s5, 10   ;;  %s1713_s6 = sld [smem:[#allocation11_spill]] }
 0x3a2   : > { %s1714_s21 = sld [smem:[#allocation12_spill]]  ;;  %s1715_s23 = smov %s1339_s24 }
 0x3a3   : > { %s1716_s24 = smov %s1521_s10  ;;  %s1717_s25 = smov %s1347_s26 }
 0x3a4   : > { %s1718_s26 = smov %s1518_s12  ;;  %s1719_s27 = smov %s1363_s30 }
 0x3a5   : > { %s1720_s28 = smov %s1367_s7  ;;  %s1721_s29 = smov %s1371_s8 }
 0x3a6   : > { %s1722_s30 = smov %s1712_s18  ;;  %16 = sbr.rel (!%p14_p6) target bundleno = 10 (0xa), region = 215 }
 0x3a7   : > { %s1723_s7 = smov %s1713_s6 }
 0x3a8   : > { %s1724_s8 = smov %s1714_s21 }

</bundles_post_ra>
